<compile_context>
chip_gen: v6e
topology: v6e:2x2x1
jax: 0.10.0
libtpu: 0.0.40
codegen_flags: <defaults>
</compile_context>

<pallas_src>
import functools

import jax
import jax.numpy as jnp
from jax.experimental import pallas as pl
from jax.experimental.pallas import tpu as pltpu


def _dws_kernel(x_ref, w_ref, b_ref, o_ref, *, k, pad, out_len):
    # x_ref : (B*C, L)        input with batch folded into the sublane (row) axis
    # w_ref : (k, B*O, B*C)   per-tap fused (pointwise . depthwise) block-diag weights
    # b_ref : (B*O, 1)        bias column (broadcasts over lanes)
    # o_ref : (B*O, out_len)  output, lane dim = length -> lane-dense stores
    x = x_ref[...]                                     # [B*C, L]
    rows = x.shape[0]

    # In-kernel halo: prepend/append `pad` zero lane-columns once (no HBM pad pre-pass).
    if pad > 0:
        z = jnp.zeros((rows, pad), dtype=x.dtype)
        xp = jnp.concatenate([z, x, z], axis=1)        # [B*C, L + 2*pad]
    else:
        xp = x

    # Depthwise + pointwise fused: k shifted matmuls accumulated in f32 on the MXU.
    # Tap j uses columns [j : j+out_len) of the halo'd input (PyTorch cross-correlation).
    acc = jnp.dot(w_ref[0], xp[:, 0:out_len],
                  preferred_element_type=jnp.float32)  # [B*O, out_len]
    for j in range(1, k):                              # k is small & static -> unrolled
        acc = acc + jnp.dot(w_ref[j], xp[:, j:j + out_len],
                            preferred_element_type=jnp.float32)

    acc = acc + b_ref[...]                             # bias broadcast over lanes
    o_ref[...] = jnp.maximum(acc, 0.0).astype(o_ref.dtype)   # ReLU


@functools.partial(jax.jit, static_argnames=("k",))
def depthwise_separable_conv_pallas(x, wd, wp, bias, *, k):
    """x: [B, C, L] (PyTorch NCL).  wd: [C, 1, k], wp: [O, C, 1], bias: [O].
    Returns F.relu(pointwise_conv(depthwise_conv(x)))  with shape [B, O, out_len]."""
    B, C, L = x.shape
    O = wp.shape[0]
    pad = k // 2
    out_len = L + 2 * pad - (k - 1)                    # == L for odd k (PyTorch 'same')

    f32 = jnp.float32
    # Fused per-tap channel-mixing weights:  Wt[j, o, c] = wp[o, c] * wd[c, j]
    wt = (wp.reshape(O, C).astype(f32)[None, :, :]
          * jnp.swapaxes(wd.reshape(C, k).astype(f32), 0, 1)[:, None, :])   # [k, O, C]

    # Fold the (tiny) batch into the same MXU contraction with a block-diagonal layout:
    #   Wblk[j, b*O+o, b*C+c] = Wt[j, o, c]   (zero off the diagonal blocks)
    # so  out_flat = relu( sum_j Wblk[j] @ shift_j(x_flat) + bias )  covers all batches
    # in one matmul per tap, with no input transpose.
    eye = jnp.eye(B, dtype=f32)
    w_taps = jnp.einsum("bd,joc->jbodc", eye, wt).reshape(k, B * O, B * C)

    bias_col = jnp.tile(bias.astype(f32).reshape(1, O), (B, 1)).reshape(B * O, 1)

    x_flat = x.reshape(B * C, L)                       # metadata-only, no HBM traffic

    kernel = functools.partial(_dws_kernel, k=k, pad=pad, out_len=out_len)

    out_flat = pl.pallas_call(
        kernel,
        out_shape=jax.ShapeDtypeStruct((B * O, out_len), jnp.float32),
        # Single program, full arrays resident in VMEM (tens of KiB total here).
        in_specs=[
            pl.BlockSpec(memory_space=pltpu.MemorySpace.VMEM),   # x_flat
            pl.BlockSpec(memory_space=pltpu.MemorySpace.VMEM),   # fused tap weights
            pl.BlockSpec(memory_space=pltpu.MemorySpace.VMEM),   # bias column
        ],
        out_specs=pl.BlockSpec(memory_space=pltpu.MemorySpace.VMEM),
    )(x_flat, w_taps, bias_col)

    return out_flat.reshape(B, O, out_len)             # metadata-only reshape


def depthwise_separable_conv_ref(x, wd, wp, bias, *, k):
    """Pure-JAX reference mirroring the PyTorch forward (cross-correlation, like Conv1d)."""
    B, C, L = x.shape
    y = jax.lax.conv_general_dilated(
        x, wd, window_strides=(1,), padding=[(k // 2, k // 2)],
        dimension_numbers=("NCH", "OIH", "NCH"), feature_group_count=C)
    z = jax.lax.conv_general_dilated(
        y, wp, window_strides=(1,), padding=[(0, 0)],
        dimension_numbers=("NCH", "OIH", "NCH"))
    return jax.nn.relu(z + bias[None, :, None])


if __name__ == "__main__":
    B, in_ch, out_ch, L, k = 2, 16, 32, 128, 3

    key = jax.random.PRNGKey(0)
    kx, kd, kp, kb = jax.random.split(key, 4)

    # Deterministic parameter init mirroring nn.Conv1d default bounds (1/sqrt(fan_in)).
    bd = 1.0 / (1 * k) ** 0.5                 # depthwise: fan_in = (in_ch/groups) * k = k
    wd = jax.random.uniform(kd, (in_ch, 1, k), jnp.float32, -bd, bd)
    bp = 1.0 / (in_ch * 1) ** 0.5             # pointwise: fan_in = in_ch * 1
    wp = jax.random.uniform(kp, (out_ch, in_ch, 1), jnp.float32, -bp, bp)
    bias = jax.random.uniform(kb, (out_ch,), jnp.float32, -bp, bp)

    # Input in PyTorch Conv1d layout [B, C, L].
    x = jax.random.normal(kx, (B, in_ch, L), jnp.float32)

    out = depthwise_separable_conv_pallas(x, wd, wp, bias, k=k)
    out = jax.block_until_ready(out)

    ref = depthwise_separable_conv_ref(x, wd, wp, bias, k=k)
    assert out.shape == (B, out_ch, L)
    assert jnp.allclose(out, ref, atol=1e-4, rtol=1e-4), "mismatch vs reference"

    print("KERNEL_OK")
</pallas_src>

<mosaic_0001>
module attributes {stable_mosaic.version = 11 : i64} {
  func.func @_dws_kernel(%arg0: memref<32x128xf32, #tpu.memory_space<vmem>>, %arg1: memref<3x64x32xf32, #tpu.memory_space<vmem>>, %arg2: memref<64x1xf32, #tpu.memory_space<vmem>>, %arg3: memref<64x128xf32, #tpu.memory_space<vmem>>) attributes {dimension_semantics = [], scalar_prefetch = 0 : i64, scratch_operands = 0 : i64, tpu.core_type = #tpu.core_type<tc>} {
    %c0 = arith.constant 0 : index
    %c0_0 = arith.constant 0 : index
    %0 = vector.load %arg0[%c0, %c0_0] : memref<32x128xf32, #tpu.memory_space<vmem>>, vector<32x128xf32>
    %cst = arith.constant 0.000000e+00 : f32
    %1 = vector.broadcast %cst : f32 to vector<32x1xf32>
    %2 = tpu.concatenate %1, %0, %1 in 1 : vector<32x1xf32>, vector<32x128xf32>, vector<32x1xf32> -> vector<32x130xf32>
    %c0_1 = arith.constant 0 : index
    %c0_2 = arith.constant 0 : index
    %c0_3 = arith.constant 0 : index
    %3 = vector.load %arg1[%c0_1, %c0_2, %c0_3] : memref<3x64x32xf32, #tpu.memory_space<vmem>>, vector<1x64x32xf32>
    %4 = vector.shape_cast %3 : vector<1x64x32xf32> to vector<64x32xf32>
    %5 = vector.extract_strided_slice %2 {offsets = [0, 0], sizes = [32, 128], strides = [1, 1]} : vector<32x130xf32> to vector<32x128xf32>
    %cst_4 = arith.constant dense<0.000000e+00> : vector<64x128xf32>
    %6 = tpu.matmul %4, %5, %cst_4 {dimension_numbers = #tpu.dot_dimension_numbers<[1], [0], [0], [1], [0, 0, 1, 1], [], []>} : vector<64x32xf32>, vector<32x128xf32>, vector<64x128xf32> -> vector<64x128xf32>
    %c1 = arith.constant 1 : index
    %c0_5 = arith.constant 0 : index
    %c0_6 = arith.constant 0 : index
    %7 = vector.load %arg1[%c1, %c0_5, %c0_6] : memref<3x64x32xf32, #tpu.memory_space<vmem>>, vector<1x64x32xf32>
    %8 = vector.shape_cast %7 : vector<1x64x32xf32> to vector<64x32xf32>
    %9 = vector.extract_strided_slice %2 {offsets = [0, 1], sizes = [32, 128], strides = [1, 1]} : vector<32x130xf32> to vector<32x128xf32>
    %cst_7 = arith.constant dense<0.000000e+00> : vector<64x128xf32>
    %10 = tpu.matmul %8, %9, %cst_7 {dimension_numbers = #tpu.dot_dimension_numbers<[1], [0], [0], [1], [0, 0, 1, 1], [], []>} : vector<64x32xf32>, vector<32x128xf32>, vector<64x128xf32> -> vector<64x128xf32>
    %11 = arith.addf %6, %10 : vector<64x128xf32>
    %c2 = arith.constant 2 : index
    %c0_8 = arith.constant 0 : index
    %c0_9 = arith.constant 0 : index
    %12 = vector.load %arg1[%c2, %c0_8, %c0_9] : memref<3x64x32xf32, #tpu.memory_space<vmem>>, vector<1x64x32xf32>
    %13 = vector.shape_cast %12 : vector<1x64x32xf32> to vector<64x32xf32>
    %14 = vector.extract_strided_slice %2 {offsets = [0, 2], sizes = [32, 128], strides = [1, 1]} : vector<32x130xf32> to vector<32x128xf32>
    %cst_10 = arith.constant dense<0.000000e+00> : vector<64x128xf32>
    %15 = tpu.matmul %13, %14, %cst_10 {dimension_numbers = #tpu.dot_dimension_numbers<[1], [0], [0], [1], [0, 0, 1, 1], [], []>} : vector<64x32xf32>, vector<32x128xf32>, vector<64x128xf32> -> vector<64x128xf32>
    %16 = arith.addf %11, %15 : vector<64x128xf32>
    %c0_11 = arith.constant 0 : index
    %c0_12 = arith.constant 0 : index
    %17 = vector.load %arg2[%c0_11, %c0_12] : memref<64x1xf32, #tpu.memory_space<vmem>>, vector<64x1xf32>
    %18 = vector.broadcast %17 : vector<64x1xf32> to vector<64x128xf32>
    %19 = arith.addf %16, %18 : vector<64x128xf32>
    %cst_13 = arith.constant 0.000000e+00 : f32
    %20 = vector.broadcast %cst_13 : f32 to vector<64x128xf32>
    %21 = arith.maximumf %19, %20 : vector<64x128xf32>
    %c0_14 = arith.constant 0 : index
    %c0_15 = arith.constant 0 : index
    %22 = vector.load %arg3[%c0_14, %c0_15] : memref<64x128xf32, #tpu.memory_space<vmem>>, vector<64x128xf32>
    tpu.vector_store %arg3[%c0_14, %c0_15], %21 {strides = array<i32>} : memref<64x128xf32, #tpu.memory_space<vmem>>, vector<64x128xf32>,
    return
  }
}

</mosaic_0001>

<bundles_post_ra>
// kernel: tile.6
= control target key start
LH: loop header
LB: loop body
LE: loop exit
PB: predicated region body
PF: predicated region fallthrough
CT: control target
= control target key end

     0   :  { %s22_s0 = inlined_call_operand.vmem [shape: f32[32], index: 0, kind: input, shape index: {}]   ;;  %s23_s1 = inlined_call_operand.vmem [shape: f32[2,1,1,32], index: 1, kind: output, shape index: {}]  }
   0x1   :  { %v4_v0 = vld [vmem:[%s22_s0] ss:$0 sm:$0xff] }
   0x2   :  { %5 = vst [vmem:[%s23_s1] sm:$0x3] %v4_v0 }

// kernel: tile.0
= control target key start
LH: loop header
LB: loop body
LE: loop exit
PB: predicated region body
PF: predicated region fallthrough
CT: control target
= control target key end

     0   :  { %s355_s8 = smov 125   ;;  %s356_s9 = smov 126   ;;  %vm8_vm0 = vcmask 7168   ;;  %s654_s0 = inlined_call_operand.vmem [shape: f32[2,1,1,32], index: 0, kind: input, shape index: {}]   ;;  %s655_s1 = inlined_call_operand.vmem [shape: f32[64,1], index: 1, kind: output, shape index: {}]  }
   0x1   :  { %v5_v0 = vld [vmem:[%s654_s0] sm:$0x3]  ;;  %s354_s0 = smov 127   ;;  %s357_s10 = smov 124  }
   0x2   :  { %6 = vst [vmem:[#allocation0] sm:$0x3] %v5_v0  ;;  %s358_s11 = smov 123   ;;  %s359_s12 = smov 122  }
   0x3   :  { %s360_s13 = smov 121   ;;  %s361_s14 = smov 120  }
   0x4   :  { %s362_s15 = smov 119   ;;  %s363_s16 = smov 118  }
   0x5   :  { %s364_s17 = smov 117   ;;  %s365_s18 = smov 116  }
   0x6   :  { %s366_s19 = smov 115   ;;  %s367_s20 = smov 114  }
   0x7   :  { %s368_s21 = smov 113   ;;  %s369_s22 = smov 112  }
   0x8   :  { %s370_s23 = smov 111   ;;  %s371_s24 = smov 110  }
   0x9   :  { %v12_v1 = vld [vmem:[#allocation0] sm:$0x3]   ;;  %s372_s25 = smov 109   ;;  %s373_s26 = smov 108  }
   0xa   :  { %v28_v2 = vld [vmem:[#allocation0] sm:$0x3]   ;;  %13 = vrot.lane.b32.xlu0 %v12_v1, %s354_s0  ;;  %s374_s27 = smov 107   ;;  %s375_s28 = smov 106  }
   0xb   :  { %29 = vrot.lane.b32.xlu1 %v28_v2, %s355_s8  ;;  %v20_v3 = vld [vmem:[#allocation0] sm:$0x3]   ;;  %s376_s29 = smov 105   ;;  %s377_s30 = smov 104  }
   0xc   :  { %v36_v4 = vld [vmem:[#allocation0] sm:$0x3]   ;;  %s378_s6 = smov 103   ;;  %s379_s7 = smov 102  }
   0xd   :  { %v44_v5 = vld [vmem:[#allocation0] sm:$0x3]   ;;  %s380_s0 = smov 101   ;;  %s381_s8 = smov 100  }
   0xe   :  { %21 = vrot.lane.b32.xlu0 %v20_v3, %s356_s9  ;;  %v52_v6 = vld [vmem:[#allocation0] sm:$0x3]   ;;  %s382_s9 = smov 99  }
   0xf   :  { %37 = vrot.lane.b32.xlu1 %v36_v4, %s357_s10  ;;  %v60_v7 = vld [vmem:[#allocation0] sm:$0x3]   ;;  %s383_s10 = smov 98  }
  0x10   :  { %v68_v8 = vld [vmem:[#allocation0] sm:$0x3]  }
  0x11   :  { %v76_v9 = vld [vmem:[#allocation0] sm:$0x3]  }
  0x12   :  { %45 = vrot.lane.b32.xlu0 %v44_v5, %s358_s11  ;;  %v84_v10 = vld [vmem:[#allocation0] sm:$0x3]   ;;  %s384_s11 = smov 97  }
  0x13   :  { %53 = vrot.lane.b32.xlu1 %v52_v6, %s359_s12  ;;  %v92_v11 = vld [vmem:[#allocation0] sm:$0x3]  }
  0x14   :  { %v100_v12 = vld [vmem:[#allocation0] sm:$0x3]  }
  0x15   :  { %v108_v13 = vld [vmem:[#allocation0] sm:$0x3]  }
  0x16   :  { %61 = vrot.lane.b32.xlu0 %v60_v7, %s360_s13  ;;  %v116_v14 = vld [vmem:[#allocation0] sm:$0x3]  }
  0x17   :  { %69 = vrot.lane.b32.xlu1 %v68_v8, %s361_s14  ;;  %v124_v15 = vld [vmem:[#allocation0] sm:$0x3]  }
  0x18   :  { %v132_v16 = vld [vmem:[#allocation0] sm:$0x3]  }
  0x19   :  { %v140_v17 = vld [vmem:[#allocation0] sm:$0x3]  }
  0x1a   :  { %77 = vrot.lane.b32.xlu0 %v76_v9, %s362_s15  ;;  %v148_v18 = vld [vmem:[#allocation0] sm:$0x3]  }
  0x1b   :  { %85 = vrot.lane.b32.xlu1 %v84_v10, %s363_s16  ;;  %v156_v19 = vld [vmem:[#allocation0] sm:$0x3]  }
  0x1c   :  { %v164_v20 = vld [vmem:[#allocation0] sm:$0x3]  }
  0x1d   :  { %v172_v21 = vld [vmem:[#allocation0] sm:$0x3]  }
  0x1e   :  { %93 = vrot.lane.b32.xlu0 %v92_v11, %s364_s17  ;;  %v180_v22 = vld [vmem:[#allocation0] sm:$0x3]  }
  0x1f   :  { %101 = vrot.lane.b32.xlu1 %v100_v12, %s365_s18  ;;  %v188_v23 = vld [vmem:[#allocation0] sm:$0x3]  }
  0x20   :  { %v196_v24 = vld [vmem:[#allocation0] sm:$0x3]  }
  0x21   :  { %v204_v25 = vld [vmem:[#allocation0] sm:$0x3]  }
  0x22   :  { %109 = vrot.lane.b32.xlu0 %v108_v13, %s366_s19  ;;  %v212_v26 = vld [vmem:[#allocation0] sm:$0x3]  }
  0x23   :  { %117 = vrot.lane.b32.xlu1 %v116_v14, %s367_s20  ;;  %v7_v27 = vld [vmem:[#allocation0] sm:$0x3]  }
  0x24   :  { %9 = vst.msk [vmem:[%s655_s1] sm:$0x1] %vm8_vm0, %v7_v27   ;;  %260 = vst.msk [vmem:[%s655_s1 + $0x1f] sm:$0x2] %vm8_vm0, %v7_v27   ;;  %v220_v28 = vld [vmem:[#allocation0] sm:$0x3]  }
  0x25   :  { %v228_v29 = vld [vmem:[#allocation0] sm:$0x3]  }
  0x26   :  { %125 = vrot.lane.b32.xlu0 %v124_v15, %s368_s21  ;;  %v236_v30 = vld [vmem:[#allocation0] sm:$0x3]  }
  0x27   :  { %133 = vrot.lane.b32.xlu1 %v132_v16, %s369_s22  ;;  %v244_v31 = vld [vmem:[#allocation0] sm:$0x3]  }
  0x28   :  { %v252_v32 = vld [vmem:[#allocation0] sm:$0x3]  }
  0x2a   :  { %141 = vrot.lane.b32.xlu0 %v140_v17, %s370_s23 }
  0x2b   :  { %149 = vrot.lane.b32.xlu1 %v148_v18, %s371_s24 }
  0x2e   :  { %157 = vrot.lane.b32.xlu0 %v156_v19, %s372_s25 }
  0x2f   :  { %165 = vrot.lane.b32.xlu1 %v164_v20, %s373_s26 }
  0x32   :  { %173 = vrot.lane.b32.xlu0 %v172_v21, %s374_s27 }
  0x33   :  { %181 = vrot.lane.b32.xlu1 %v180_v22, %s375_s28 }
  0x36   :  { %189 = vrot.lane.b32.xlu0 %v188_v23, %s376_s29 }
  0x37   :  { %197 = vrot.lane.b32.xlu1 %v196_v24, %s377_s30 }
  0x3a   :  { %205 = vrot.lane.b32.xlu0 %v204_v25, %s378_s6 }
  0x3b   :  { %213 = vrot.lane.b32.xlu1 %v212_v26, %s379_s7 }
  0x3e   :  { %221 = vrot.lane.b32.xlu0 %v220_v28, %s380_s0 }
  0x3f   :  { %229 = vrot.lane.b32.xlu1 %v228_v29, %s381_s8 }
  0x42   :  { %237 = vrot.lane.b32.xlu0 %v236_v30, %s382_s9 }
  0x43   :  { %245 = vrot.lane.b32.xlu1 %v244_v31, %s383_s10 }
  0x46   :  { %253 = vrot.lane.b32.xlu0 %v252_v32, %s384_s11 }
  0x7c   :  { %v14_v33 = vpop.permute.xlu0 %13  }
  0x7d   :  { %v30_v34 = vpop.permute.xlu1 %29   ;;  %261 = vst.msk [vmem:[%s655_s1 + $0x1] sm:$0x1] %vm8_vm0, %v14_v33   ;;  %262 = vst.msk [vmem:[%s655_s1 + $0x20] sm:$0x2] %vm8_vm0, %v14_v33  }
  0x7e   :  { %265 = vst.msk [vmem:[%s655_s1 + $0x3] sm:$0x1] %vm8_vm0, %v30_v34   ;;  %266 = vst.msk [vmem:[%s655_s1 + $0x22] sm:$0x2] %vm8_vm0, %v30_v34  }
  0x80   :  { %v22_v35 = vpop.permute.xlu0 %21  }
  0x81   :  { %v38_v36 = vpop.permute.xlu1 %37   ;;  %263 = vst.msk [vmem:[%s655_s1 + $0x2] sm:$0x1] %vm8_vm0, %v22_v35   ;;  %264 = vst.msk [vmem:[%s655_s1 + $0x21] sm:$0x2] %vm8_vm0, %v22_v35  }
  0x82   :  { %267 = vst.msk [vmem:[%s655_s1 + $0x4] sm:$0x1] %vm8_vm0, %v38_v36   ;;  %268 = vst.msk [vmem:[%s655_s1 + $0x23] sm:$0x2] %vm8_vm0, %v38_v36  }
  0x84   :  { %v46_v37 = vpop.permute.xlu0 %45  }
  0x85   :  { %v54_v38 = vpop.permute.xlu1 %53   ;;  %269 = vst.msk [vmem:[%s655_s1 + $0x5] sm:$0x1] %vm8_vm0, %v46_v37   ;;  %270 = vst.msk [vmem:[%s655_s1 + $0x24] sm:$0x2] %vm8_vm0, %v46_v37  }
  0x86   :  { %271 = vst.msk [vmem:[%s655_s1 + $0x6] sm:$0x1] %vm8_vm0, %v54_v38   ;;  %272 = vst.msk [vmem:[%s655_s1 + $0x25] sm:$0x2] %vm8_vm0, %v54_v38  }
  0x88   :  { %v62_v39 = vpop.permute.xlu0 %61  }
  0x89   :  { %v70_v40 = vpop.permute.xlu1 %69   ;;  %273 = vst.msk [vmem:[%s655_s1 + $0x7] sm:$0x1] %vm8_vm0, %v62_v39   ;;  %274 = vst.msk [vmem:[%s655_s1 + $0x26] sm:$0x2] %vm8_vm0, %v62_v39  }
  0x8a   :  { %275 = vst.msk [vmem:[%s655_s1 + $0x8] sm:$0x1] %vm8_vm0, %v70_v40   ;;  %276 = vst.msk [vmem:[%s655_s1 + $0x27] sm:$0x2] %vm8_vm0, %v70_v40  }
  0x8c   :  { %v78_v41 = vpop.permute.xlu0 %77  }
  0x8d   :  { %v86_v42 = vpop.permute.xlu1 %85   ;;  %277 = vst.msk [vmem:[%s655_s1 + $0x9] sm:$0x1] %vm8_vm0, %v78_v41   ;;  %278 = vst.msk [vmem:[%s655_s1 + $0x28] sm:$0x2] %vm8_vm0, %v78_v41  }
  0x8e   :  { %279 = vst.msk [vmem:[%s655_s1 + $0xa] sm:$0x1] %vm8_vm0, %v86_v42   ;;  %280 = vst.msk [vmem:[%s655_s1 + $0x29] sm:$0x2] %vm8_vm0, %v86_v42  }
  0x90   :  { %v94_v43 = vpop.permute.xlu0 %93  }
  0x91   :  { %v102_v44 = vpop.permute.xlu1 %101   ;;  %281 = vst.msk [vmem:[%s655_s1 + $0xb] sm:$0x1] %vm8_vm0, %v94_v43   ;;  %282 = vst.msk [vmem:[%s655_s1 + $0x2a] sm:$0x2] %vm8_vm0, %v94_v43  }
  0x92   :  { %283 = vst.msk [vmem:[%s655_s1 + $0xc] sm:$0x1] %vm8_vm0, %v102_v44   ;;  %284 = vst.msk [vmem:[%s655_s1 + $0x2b] sm:$0x2] %vm8_vm0, %v102_v44  }
  0x94   :  { %v110_v45 = vpop.permute.xlu0 %109  }
  0x95   :  { %v118_v46 = vpop.permute.xlu1 %117   ;;  %285 = vst.msk [vmem:[%s655_s1 + $0xd] sm:$0x1] %vm8_vm0, %v110_v45   ;;  %286 = vst.msk [vmem:[%s655_s1 + $0x2c] sm:$0x2] %vm8_vm0, %v110_v45  }
  0x96   :  { %287 = vst.msk [vmem:[%s655_s1 + $0xe] sm:$0x1] %vm8_vm0, %v118_v46   ;;  %288 = vst.msk [vmem:[%s655_s1 + $0x2d] sm:$0x2] %vm8_vm0, %v118_v46  }
  0x98   :  { %v126_v47 = vpop.permute.xlu0 %125  }
  0x99   :  { %v134_v48 = vpop.permute.xlu1 %133   ;;  %289 = vst.msk [vmem:[%s655_s1 + $0xf] sm:$0x1] %vm8_vm0, %v126_v47   ;;  %290 = vst.msk [vmem:[%s655_s1 + $0x2e] sm:$0x2] %vm8_vm0, %v126_v47  }
  0x9a   :  { %291 = vst.msk [vmem:[%s655_s1 + $0x10] sm:$0x1] %vm8_vm0, %v134_v48   ;;  %292 = vst.msk [vmem:[%s655_s1 + $0x2f] sm:$0x2] %vm8_vm0, %v134_v48  }
  0x9c   :  { %v142_v49 = vpop.permute.xlu0 %141  }
  0x9d   :  { %v150_v50 = vpop.permute.xlu1 %149   ;;  %293 = vst.msk [vmem:[%s655_s1 + $0x11] sm:$0x1] %vm8_vm0, %v142_v49   ;;  %294 = vst.msk [vmem:[%s655_s1 + $0x30] sm:$0x2] %vm8_vm0, %v142_v49  }
  0x9e   :  { %295 = vst.msk [vmem:[%s655_s1 + $0x12] sm:$0x1] %vm8_vm0, %v150_v50   ;;  %296 = vst.msk [vmem:[%s655_s1 + $0x31] sm:$0x2] %vm8_vm0, %v150_v50  }
  0xa0   :  { %v158_v51 = vpop.permute.xlu0 %157  }
  0xa1   :  { %v166_v52 = vpop.permute.xlu1 %165   ;;  %297 = vst.msk [vmem:[%s655_s1 + $0x13] sm:$0x1] %vm8_vm0, %v158_v51   ;;  %298 = vst.msk [vmem:[%s655_s1 + $0x32] sm:$0x2] %vm8_vm0, %v158_v51  }
  0xa2   :  { %299 = vst.msk [vmem:[%s655_s1 + $0x14] sm:$0x1] %vm8_vm0, %v166_v52   ;;  %300 = vst.msk [vmem:[%s655_s1 + $0x33] sm:$0x2] %vm8_vm0, %v166_v52  }
  0xa4   :  { %v174_v53 = vpop.permute.xlu0 %173  }
  0xa5   :  { %v182_v54 = vpop.permute.xlu1 %181   ;;  %301 = vst.msk [vmem:[%s655_s1 + $0x15] sm:$0x1] %vm8_vm0, %v174_v53   ;;  %302 = vst.msk [vmem:[%s655_s1 + $0x34] sm:$0x2] %vm8_vm0, %v174_v53  }
  0xa6   :  { %303 = vst.msk [vmem:[%s655_s1 + $0x16] sm:$0x1] %vm8_vm0, %v182_v54   ;;  %304 = vst.msk [vmem:[%s655_s1 + $0x35] sm:$0x2] %vm8_vm0, %v182_v54  }
  0xa8   :  { %v190_v55 = vpop.permute.xlu0 %189  }
  0xa9   :  { %v198_v56 = vpop.permute.xlu1 %197   ;;  %305 = vst.msk [vmem:[%s655_s1 + $0x17] sm:$0x1] %vm8_vm0, %v190_v55   ;;  %306 = vst.msk [vmem:[%s655_s1 + $0x36] sm:$0x2] %vm8_vm0, %v190_v55  }
  0xaa   :  { %307 = vst.msk [vmem:[%s655_s1 + $0x18] sm:$0x1] %vm8_vm0, %v198_v56   ;;  %308 = vst.msk [vmem:[%s655_s1 + $0x37] sm:$0x2] %vm8_vm0, %v198_v56  }
  0xac   :  { %v206_v57 = vpop.permute.xlu0 %205  }
  0xad   :  { %v214_v58 = vpop.permute.xlu1 %213   ;;  %309 = vst.msk [vmem:[%s655_s1 + $0x19] sm:$0x1] %vm8_vm0, %v206_v57   ;;  %310 = vst.msk [vmem:[%s655_s1 + $0x38] sm:$0x2] %vm8_vm0, %v206_v57  }
  0xae   :  { %311 = vst.msk [vmem:[%s655_s1 + $0x1a] sm:$0x1] %vm8_vm0, %v214_v58   ;;  %312 = vst.msk [vmem:[%s655_s1 + $0x39] sm:$0x2] %vm8_vm0, %v214_v58  }
  0xb0   :  { %v222_v59 = vpop.permute.xlu0 %221  }
  0xb1   :  { %v230_v60 = vpop.permute.xlu1 %229   ;;  %313 = vst.msk [vmem:[%s655_s1 + $0x1b] sm:$0x1] %vm8_vm0, %v222_v59   ;;  %314 = vst.msk [vmem:[%s655_s1 + $0x3a] sm:$0x2] %vm8_vm0, %v222_v59  }
  0xb2   :  { %315 = vst.msk [vmem:[%s655_s1 + $0x1c] sm:$0x1] %vm8_vm0, %v230_v60   ;;  %316 = vst.msk [vmem:[%s655_s1 + $0x3b] sm:$0x2] %vm8_vm0, %v230_v60  }
  0xb4   :  { %v238_v61 = vpop.permute.xlu0 %237  }
  0xb5   :  { %v246_v62 = vpop.permute.xlu1 %245   ;;  %317 = vst.msk [vmem:[%s655_s1 + $0x1d] sm:$0x1] %vm8_vm0, %v238_v61   ;;  %318 = vst.msk [vmem:[%s655_s1 + $0x3c] sm:$0x2] %vm8_vm0, %v238_v61  }
  0xb6   :  { %319 = vst.msk [vmem:[%s655_s1 + $0x1e] sm:$0x1] %vm8_vm0, %v246_v62   ;;  %320 = vst.msk [vmem:[%s655_s1 + $0x3d] sm:$0x2] %vm8_vm0, %v246_v62  }
  0xb8   :  { %v254_v63 = vpop.permute.xlu0 %253  }
  0xb9   :  { %321 = vst.msk [vmem:[%s655_s1 + $0x1f] sm:$0x1] %vm8_vm0, %v254_v63   ;;  %322 = vst.msk [vmem:[%s655_s1 + $0x3e] sm:$0x2] %vm8_vm0, %v254_v63  }

// kernel: depthwise_separable_conv_pallas.1
= control target key start
LH: loop header
LB: loop body
LE: loop exit
PB: predicated region body
PF: predicated region fallthrough
CT: control target
= control target key end

     0   :  { %s795_s16 = smov 1   ;;  %s1018_s0 = inlined_call_operand.vmem [shape: f32[32,128], index: 0, kind: input, shape index: {}]   ;;  %s1019_s1 = inlined_call_operand.vmem [shape: f32[3,64,32], index: 1, kind: input, shape index: {}]   ;;  %s1020_s2 = inlined_call_operand.vmem [shape: f32[64,1], index: 2, kind: input, shape index: {}]   ;;  %s1021_s3 = inlined_call_operand.hbm [shape: f32[64,128], index: 3, kind: output, shape index: {}]  }
   0x1   :  { %v18_v0 = vld [vmem:[%s1018_s0 + $0x18] sm:$0xff]  ;;  %v16_v1 = vld [vmem:[%s1018_s0 + $0x8] sm:$0xff] }
   0x2   :  { %29 = vrot.lane.b32.xlu0 %v18_v0, %s795_s16  ;;  %25 = vrot.lane.b32.xlu1 %v16_v1, %s795_s16 }
   0x3   :  { %8 = vsyncpa [#allocation3], 0  ;;  %v17_v2 = vld [vmem:[%s1018_s0 + $0x10] sm:$0xff]  ;;  %v15_v3 = vld [vmem:[%s1018_s0] sm:$0xff]  ;;  %vm35_vm0 = vcmask 7168   ;;  %s796_s21 = smov 127  }
   0x4   :  { %v616_v8 = vld [vmem:[%s1019_s1 + $0x60] sm:$0xff]  ;;  %vm94_vm1 = vcmask 261120   ;;  %s797_s25 = smov 126   ;;  %v525_v18 = vld [vmem:[%s1020_s2 + $0x8] sm:$0xff]  ;;  %v798_v20 = vmov 0   ;;  %v526_v21 = vld [vmem:[%s1020_s2 + $0x10] sm:$0xff] }
   0x5   :  { %710 = vmatprep.mubr.msk.f32.mxu1 %vm94_vm1, %v616_v8  ;;  %v612_v12 = vld [vmem:[%s1019_s1 + $0x40] sm:$0xff]  ;;  %772 = vset.pattern.permute.xlu1 %v798_v20  ;;  %v527_v22 = vld [vmem:[%s1020_s2 + $0x18] sm:$0xff]  ;;  %v529_v24 = vld [vmem:[%s1020_s2 + $0x28] sm:$0xff]  ;;  %vm85_vm2 = vcmask 1039360   ;;  %vm378_vm4 = vcmask 1031168  }
   0x6   :  { %27 = vrot.lane.b32.xlu0 %v17_v2, %s795_s16  ;;  %23 = vrot.lane.b32.xlu1 %v15_v3, %s795_s16  ;;  %v524_v19 = vld [vmem:[%s1020_s2] sm:$0xff]  ;;  %v530_v25 = vld [vmem:[%s1020_s2 + $0x30] sm:$0xff]  ;;  %vm898_vm3 = vmneg %vm35_vm0 }
   0x7   :  { %704 = vmatprep.mubr.msk.f32.mxu0 %vm94_vm1, %v612_v12  ;;  %771 = vset.pattern.permute.xlu0 %v798_v20  ;;  %v528_v23 = vld [vmem:[%s1020_s2 + $0x20] sm:$0xff]  ;;  %v531_v26 = vld [vmem:[%s1020_s2 + $0x38] sm:$0xff]  ;;  %v617_v39 = vld [vmem:[%s1019_s1 + $0x68] sm:$0xff] }
   0x8   :  { %v613_v41 = vld [vmem:[%s1019_s1 + $0x48] sm:$0xff]  ;;  %v618_v44 = vld [vmem:[%s1019_s1 + $0x70] sm:$0xff]  ;;  %v619_v46 = vld [vmem:[%s1019_s1 + $0x78] sm:$0xff] }
   0x9   :  { %v44_v47 = vld [vmem:[%s1019_s1] sm:$0xff]  ;;  %v614_v51 = vld [vmem:[%s1019_s1 + $0x50] sm:$0xff]  ;;  %v45_v52 = vld [vmem:[%s1019_s1 + $0x8] sm:$0xff] }
   0xa   :  { %v615_v53 = vld [vmem:[%s1019_s1 + $0x58] sm:$0xff]  ;;  %v46_v54 = vld [vmem:[%s1019_s1 + $0x10] sm:$0xff]  ;;  %v644_v57 = vld [vmem:[%s1019_s1 + $0x80] sm:$0xff] }
   0xb   :  { %v47_v59 = vld [vmem:[%s1019_s1 + $0x18] sm:$0xff]  ;;  %v48_v60 = vld [vmem:[%s1019_s1 + $0x20] sm:$0xff]  ;;  %v645_v0 = vld [vmem:[%s1019_s1 + $0x88] sm:$0xff] }
   0xc   :  { %v49_v1 = vld [vmem:[%s1019_s1 + $0x28] sm:$0xff]  ;;  %v646_v2 = vld [vmem:[%s1019_s1 + $0x90] sm:$0xff] }
   0xd   :  { %v50_v3 = vld [vmem:[%s1019_s1 + $0x30] sm:$0xff] }
   0xe   :  { %v650_v8 = vld [vmem:[%s1019_s1 + $0xb0] sm:$0xff] }
  0x74   :  { %v834_v4 = vpop.permute.xlu0 %29  ;;  %v840_v7 = vpop.permute.xlu1 %25 }
  0x75   :  { %v39_v5 = vsel %vm35_vm0, 0.0, %v834_v4  ;;  %v43_v6 = vsel %vm35_vm0, %v834_v4, 0.0  ;;  %v37_v13 = vsel %vm35_vm0, 0.0, %v840_v7  ;;  %v41_v14 = vsel %vm35_vm0, %v840_v7, 0.0 }
  0x76   :  { %81 = vrot.lane.b32.xlu0 %v39_v5, %s796_s21  ;;  %83 = vrot.lane.b32.xlu1 %v43_v6, %s796_s21 }
  0x78   :  { %v846_v9 = vpop.permute.xlu0 %27  ;;  %v860_v15 = vpop.permute.xlu1 %23 }
  0x79   :  { %v38_v10 = vsel %vm35_vm0, 0.0, %v846_v9  ;;  %v42_v11 = vsel %vm35_vm0, %v846_v9, 0.0  ;;  %v40_v16 = vsel %vm35_vm0, %v860_v15, 0.0  ;;  %v36_v17 = vsel %vm35_vm0, 0.0, %v860_v15 }
  0x7a   :  { %77 = vrot.lane.b32.xlu0 %v38_v10, %s796_s21  ;;  %79 = vrot.lane.b32.xlu1 %v42_v11, %s796_s21 }
  0x7e   :  { %73 = vrot.lane.b32.xlu0 %v37_v13, %s796_s21  ;;  %75 = vrot.lane.b32.xlu1 %v41_v14, %s796_s21 }
  0x82   :  { %71 = vrot.lane.b32.xlu1 %v40_v16, %s796_s21  ;;  %69 = vrot.lane.b32.xlu0 %v36_v17, %s796_s21 }
  0x86   :  { %376 = vrot.lane.b32.xlu1 %v43_v6, %s797_s25  ;;  %374 = vrot.lane.b32.xlu0 %v39_v5, %s797_s25  ;;  %v51_v5 = vld [vmem:[%s1019_s1 + $0x38] sm:$0xff]  ;;  %v648_v6 = vld [vmem:[%s1019_s1 + $0xa0] sm:$0xff] }
  0x8a   :  { %372 = vrot.lane.b32.xlu1 %v42_v11, %s797_s25  ;;  %370 = vrot.lane.b32.xlu0 %v38_v10, %s797_s25 }
  0x8e   :  { %368 = vrot.lane.b32.xlu1 %v41_v14, %s797_s25  ;;  %366 = vrot.lane.b32.xlu0 %v37_v13, %s797_s25 }
  0x92   :  { %364 = vrot.lane.b32.xlu1 %v40_v16, %s797_s25  ;;  %362 = vrot.lane.b32.xlu0 %v36_v17, %s797_s25 }
  0x96   :  { %539 = vperm.xlu1 %772, %v525_v18   ;;  %534 = vperm.xlu0 %771, %v524_v19  }
  0x9a   :  { %544 = vperm.xlu1 %772, %v526_v21   ;;  %549 = vperm.xlu0 %771, %v527_v22  }
  0x9e   :  { %554 = vperm.xlu1 %772, %v528_v23   ;;  %559 = vperm.xlu0 %771, %v529_v24  }
  0xa2   :  { %564 = vperm.xlu1 %772, %v530_v25   ;;  %569 = vperm.xlu0 %771, %v531_v26  }
  0xe8   :  { %v82_v27 = vpop.permute.xlu0 %81  ;;  %v84_v28 = vpop.permute.xlu1 %83 }
  0xe9   :  { %v89_v29 = vsel %vm85_vm2, %v82_v27, %v84_v28 }
  0xea   :  { %696 = vmatprep.subr.mxu0 %v89_v29  ;;  %756 = vmatprep.subr.mxu1 %v89_v29 }
  0xeb   :  { %697 = vmatpush3.msra.mxu0 %v89_v29  ;;  %760 = vmatpush3.msra.mxu1 %v89_v29 }
  0xec   :  { %v78_v30 = vpop.permute.xlu0 %77  ;;  %v80_v31 = vpop.permute.xlu1 %79 }
  0xed   :  { %v88_v32 = vsel %vm85_vm2, %v78_v30, %v80_v31 }
  0xee   :  { %698 = vmatprep.subr.mxu0 %v88_v32  ;;  %757 = vmatprep.subr.mxu1 %v88_v32 }
  0xef   :  { %699 = vmatpush3.msra.mxu0 %v88_v32  ;;  %761 = vmatpush3.msra.mxu1 %v88_v32 }
  0xf0   :  { %v74_v33 = vpop.permute.xlu0 %73  ;;  %v76_v34 = vpop.permute.xlu1 %75 }
  0xf1   :  { %v87_v35 = vsel %vm85_vm2, %v74_v33, %v76_v34 }
  0xf2   :  { %700 = vmatprep.subr.mxu0 %v87_v35  ;;  %758 = vmatprep.subr.mxu1 %v87_v35 }
  0xf3   :  { %701 = vmatpush3.msra.mxu0 %v87_v35  ;;  %762 = vmatpush3.msra.mxu1 %v87_v35 }
  0xf4   :  { %v70_v36 = vpop.permute.xlu0 %69  ;;  %v72_v37 = vpop.permute.xlu1 %71 }
  0xf5   :  { %v86_v38 = vsel %vm85_vm2, %v70_v36, %v72_v37 }
  0xf6   :  { %702 = vmatprep.subr.mxu0 %v86_v38  ;;  %759 = vmatprep.subr.mxu1 %v86_v38 }
  0xf7   :  { %703 = vmatpush3.msra.mxu0 %v86_v38  ;;  %763 = vmatpush3.msra.mxu1 %v86_v38 }
  0xf8   :  { %v375_v42 = vpop.permute.xlu0 %374  ;;  %711 = vmatmul.mubr.msk.f32.vlgmr.msra.gmra.mxu1 %vm94_vm1, %v617_v39  ;;  %716 = vmatprep.subr.msk.mxu1 %vm898_vm3, %v834_v4  ;;  %v377_v43 = vpop.permute.xlu1 %376 }
  0xf9   :  { %717 = vmatpush3.msk.msra.mxu1 %vm898_vm3, %v834_v4  ;;  %v382_v45 = vsel %vm378_vm4, %v375_v42, %v377_v43  ;;  %705 = vmatmul.mubr.msk.f32.vlgmr.msra.gmra.mxu0 %vm94_vm1, %v613_v41  ;;  %v647_v4 = vld [vmem:[%s1019_s1 + $0x98] sm:$0xff] }
  0xfa   :  { %718 = vmatprep.subr.msk.mxu1 %vm898_vm3, %v846_v9  ;;  %736 = vmatprep.subr.mxu0 %v382_v45 }
  0xfb   :  { %713 = vmatprep.mubr.msk.f32.mxu1 %vm94_vm1, %v618_v44  ;;  %719 = vmatpush3.msk.msra.mxu1 %vm898_vm3, %v846_v9  ;;  %v651_v9 = vld [vmem:[%s1019_s1 + $0xb8] sm:$0xff] }
  0xfc   :  { %737 = vmatpush3.msra.mxu0 %v382_v45  ;;  %v371_v48 = vpop.permute.xlu0 %370  ;;  %714 = vmatmul.mubr.msk.f32.gmra.mxu1 %vm94_vm1, %v619_v46  ;;  %v373_v49 = vpop.permute.xlu1 %372 }
  0xfd   :  { %720 = vmatprep.subr.msk.mxu1 %vm898_vm3, %v840_v7  ;;  %v381_v50 = vsel %vm378_vm4, %v371_v48, %v373_v49  ;;  %724 = vmatprep.mubr.msk.f32.mxu1 %vm94_vm1, %v44_v47 }
  0xfe   :  { %721 = vmatpush3.msk.msra.mxu1 %vm898_vm3, %v840_v7  ;;  %738 = vmatprep.subr.mxu0 %v381_v50  ;;  %v649_v7 = vld [vmem:[%s1019_s1 + $0xa8] sm:$0xff]  ;;  %s799_s1 = smov [#allocation2]  }
  0xff   :  { %722 = vmatprep.subr.msk.mxu1 %vm898_vm3, %v860_v15  ;;  %739 = vmatpush3.msra.mxu0 %v381_v50  ;;  %s601_s28 = sshll.u32 %s799_s1, 4  ;;  %s602_s28 = int_to_ptr.vmem [resolvable:$true] %s601_s28 }
 0x100   :  { %723 = vmatpush3.msk.msra.mxu1 %vm898_vm3, %v860_v15  ;;  %v367_v55 = vpop.permute.xlu0 %366  ;;  %v369_v56 = vpop.permute.xlu1 %368  ;;  %707 = vmatprep.mubr.msk.f32.mxu0 %vm94_vm1, %v614_v51  ;;  %s773_s29 = scalar_lea.vmem %s602_s28, 1024  ;;  %p778_p1 = scmp.lt.s32.totalorder %s602_s28, %s602_s28 }
 0x101   :  { %725 = vmatmul.mubr.msk.f32.vlgmr.msra.gmra.mxu1 %vm94_vm1, %v45_v52  ;;  %v380_v58 = vsel %vm378_vm4, %v367_v55, %v369_v56  ;;  %708 = vmatmul.mubr.msk.f32.gmra.mxu0 %vm94_vm1, %v615_v53  ;;  %p774_p0 = scmp.ne.s32.totalorder %s602_s28, %s773_s29  ;;  %p779_p2 = scmp.lt.s32.totalorder %s773_s29, %s773_s29 }
 0x102   :  { %740 = vmatprep.subr.mxu0 %v380_v58  ;;  %727 = vmatprep.mubr.msk.f32.mxu1 %vm94_vm1, %v46_v54 }
 0x103   :  { %741 = vmatpush3.msra.mxu0 %v380_v58  ;;  %744 = vmatprep.mubr.msk.f32.mxu0 %vm94_vm1, %v644_v57  ;;  %p780_p3 = por %p779_p2, %p778_p1 }
 0x104   :  { %v363_v61 = vpop.permute.xlu0 %362  ;;  %v365_v62 = vpop.permute.xlu1 %364 }
 0x105   :  { %728 = vmatmul.mubr.msk.f32.gmra.mxu1 %vm94_vm1, %v47_v59  ;;  %v379_v63 = vsel %vm378_vm4, %v363_v61, %v365_v62  ;;  %p781_p4 = pnand %p780_p3, %p774_p0 }
 0x106   :  { %742 = vmatprep.subr.mxu0 %v379_v63  ;;  %730 = vmatprep.mubr.msk.f32.mxu1 %vm94_vm1, %v48_v60 }
 0x107   :  { %743 = vmatpush3.msra.mxu0 %v379_v63 }
 0x108   :  { %745 = vmatmul.mubr.msk.f32.vlgmr.msra.gmra.mxu0 %vm94_vm1, %v645_v0 }
 0x109   :  { %731 = vmatmul.mubr.msk.f32.gmra.mxu1 %vm94_vm1, %v49_v1  ;;  %747 = vmatprep.mubr.msk.f32.mxu0 %vm94_vm1, %v646_v2 }
 0x10a   :  { %733 = vmatprep.mubr.msk.f32.mxu1 %vm94_vm1, %v50_v3 }
 0x10c   :  { %748 = vmatmul.mubr.msk.f32.gmra.mxu0 %vm94_vm1, %v647_v4 }
 0x10d   :  { %734 = vmatmul.mubr.msk.f32.gmra.mxu1 %vm94_vm1, %v51_v5  ;;  %750 = vmatprep.mubr.msk.f32.mxu0 %vm94_vm1, %v648_v6 }
 0x110   :  { %751 = vmatmul.mubr.msk.f32.gmra.mxu0 %vm94_vm1, %v649_v7 }
 0x111   :  { %753 = vmatprep.mubr.msk.f32.mxu0 %vm94_vm1, %v650_v8  ;;  %v535_v19 = vpop.permute.xlu0 %534  ;;  %v540_v20 = vpop.permute.xlu1 %539 }
 0x114   :  { %754 = vmatmul.mubr.msk.f32.gmra.mxu0 %vm94_vm1, %v651_v9 }
 0x115   :  { %v550_v29 = vpop.permute.xlu0 %549  ;;  %v545_v32 = vpop.permute.xlu1 %544 }
 0x119   :  { %v560_v47 = vpop.permute.xlu0 %559  ;;  %v555_v49 = vpop.permute.xlu1 %554 }
 0x11d   :  { %v570_v1 = vpop.permute.xlu0 %569  ;;  %v565_v6 = vpop.permute.xlu1 %564 }
 0x1b8   :  { %v712_v10 = vpop.f32.mrf.mxu1 }
 0x1b9   :  { %v706_v12 = vpop.f32.mrf.mxu0 }
 0x1ba   :  { %v205_v11 = vpop.f32.mrf.mxu1 }
 0x1bb   :  { %v185_v15 = vpop.f32.mrf.mxu0 }
 0x1bc   :  { %v715_v13 = vpop.f32.mrf.mxu1 }
 0x1be   :  { %v215_v14 = vpop.f32.mrf.mxu1 }
 0x1c1   :  { %v726_v16 = vpop.f32.mrf.mxu1  ;;  %v709_v17 = vpop.f32.mrf.mxu0 }
 0x1c2   :  { %v320_v23 = vadd.f32 %v726_v16, %v706_v12 }
 0x1c3   :  { %v314_v18 = vpop.f32.mrf.mxu1  ;;  %v195_v22 = vpop.f32.mrf.mxu0 }
 0x1c4   :  { %v315_v26 = vadd.f32 %v314_v18, %v185_v15 }
 0x1c5   :  { %v729_v21 = vpop.f32.mrf.mxu1 }
 0x1c6   :  { %v330_v31 = vadd.f32 %v729_v21, %v709_v17 }
 0x1c7   :  { %v324_v24 = vpop.f32.mrf.mxu1 }
 0x1c8   :  { %v746_v25 = vpop.f32.mrf.mxu0  ;;  %v325_v37 = vadd.f32 %v324_v24, %v195_v22 }
 0x1c9   :  { %v732_v27 = vpop.f32.mrf.mxu1  ;;  %v517_v28 = vadd.f32 %v746_v25, %v320_v23 }
 0x1ca   :  { %v477_v30 = vpop.f32.mrf.mxu0  ;;  %v340_v43 = vadd.f32 %v732_v27, %v712_v10 }
 0x1cb   :  { %v573_v33 = vadd.f32 %v540_v20, %v517_v28  ;;  %v334_v34 = vpop.f32.mrf.mxu1  ;;  %v516_v35 = vadd.f32 %v477_v30, %v315_v26 }
 0x1cc   :  { %v749_v36 = vpop.f32.mrf.mxu0  ;;  %v335_v50 = vadd.f32 %v334_v34, %v205_v11 }
 0x1cd   :  { %v581_v38 = vmax.f32 %v573_v33, 0.0  ;;  %v572_v39 = vadd.f32 %v535_v19, %v516_v35  ;;  %v519_v40 = vadd.f32 %v749_v36, %v330_v31  ;;  %v735_v41 = vpop.f32.mrf.mxu1 }
 0x1ce   :  { %v487_v42 = vpop.f32.mrf.mxu0  ;;  %v350_v56 = vadd.f32 %v735_v41, %v715_v13 }
 0x1cf   :  { %589 = vst [vmem:[#allocation2 + $0x8] sm:$0xff] %v581_v38  ;;  %v580_v44 = vmax.f32 %v572_v39, 0.0  ;;  %v575_v45 = vadd.f32 %v550_v29, %v519_v40  ;;  %v518_v46 = vadd.f32 %v487_v42, %v325_v37  ;;  %v344_v54 = vpop.f32.mrf.mxu1 }
 0x1d0   :  { %v752_v48 = vpop.f32.mrf.mxu0  ;;  %v345_v61 = vadd.f32 %v344_v54, %v215_v14 }
 0x1d1   :  { %588 = vst [vmem:[#allocation2] sm:$0xff] %v580_v44  ;;  %v583_v51 = vmax.f32 %v575_v45, 0.0  ;;  %v574_v52 = vadd.f32 %v545_v32, %v518_v46  ;;  %v521_v53 = vadd.f32 %v752_v48, %v340_v43 }
 0x1d2   :  { %v497_v55 = vpop.f32.mrf.mxu0 }
 0x1d3   :  { %591 = vst [vmem:[#allocation2 + $0x18] sm:$0xff] %v583_v51  ;;  %v582_v57 = vmax.f32 %v574_v52, 0.0  ;;  %v577_v58 = vadd.f32 %v560_v47, %v521_v53  ;;  %v520_v59 = vadd.f32 %v497_v55, %v335_v50 }
 0x1d4   :  { %v755_v60 = vpop.f32.mrf.mxu0 }
 0x1d5   :  { %590 = vst [vmem:[#allocation2 + $0x10] sm:$0xff] %v582_v57  ;;  %v585_v62 = vmax.f32 %v577_v58, 0.0  ;;  %v576_v63 = vadd.f32 %v555_v49, %v520_v59  ;;  %v523_v0 = vadd.f32 %v755_v60, %v350_v56 }
 0x1d6   :  { %v507_v2 = vpop.f32.mrf.mxu0 }
 0x1d7   :  { %593 = vst [vmem:[#allocation2 + $0x28] sm:$0xff] %v585_v62  ;;  %v584_v3 = vmax.f32 %v576_v63, 0.0  ;;  %v579_v4 = vadd.f32 %v570_v1, %v523_v0  ;;  %v522_v5 = vadd.f32 %v507_v2, %v345_v61 }
 0x1d9   :  { %592 = vst [vmem:[#allocation2 + $0x20] sm:$0xff] %v584_v3  ;;  %v587_v7 = vmax.f32 %v579_v4, 0.0  ;;  %v578_v8 = vadd.f32 %v565_v6, %v522_v5 }
 0x1db   :  { %595 = vst [vmem:[#allocation2 + $0x38] sm:$0xff] %v587_v7  ;;  %v586_v9 = vmax.f32 %v578_v8, 0.0 }
 0x1dd   :  { %594 = vst [vmem:[#allocation2 + $0x30] sm:$0xff] %v586_v9 }
 0x1de   :  { %784 = shalt.err (!%p781_p4)
}
 0x1df   :  { %s800_s30 = smov 128   ;;  %s801_s4 = smov 8  }
 0x1e0   :  { %607 = dma.vmem_to_hbm [thread:$0]  %s602_s28, 1024, %s1021_s3, [#allocation3], %s800_s30, %s800_s30, %s801_s4  }
 0x1e1   :  { %793 = dma.done.wait [#allocation3], 1024  }
 0x1e2   :  { %794 = vsyncadd [#allocation3], 4294966272 }
 0x1e3   :  { %611 = vsyncpa [#allocation3], 1 }

</bundles_post_ra>
